<compile_context>
chip_gen: v5e
topology: v5e:2x2
jax: 0.10.0
libtpu: 0.0.40
codegen_flags: <defaults>
</compile_context>

<pallas_src>
import jax
import jax.numpy as jnp
from jax.experimental import pallas as pl
from jax.experimental.pallas import tpu as pltpu

BN_EPS = 1e-5


def _mlp_kernel(x_ref, w1_ref, b1_ref, w2_ref, b2_ref, o_ref):
    # Hidden layer (BN already folded into w1/b1): x @ W1_eff + b1_eff, then ReLU.
    h = jnp.dot(x_ref[...], w1_ref[...], preferred_element_type=jnp.float32)
    h = jnp.maximum(h + b1_ref[...], 0.0)

    # Dropout: identity in eval mode.

    # Output layer (lane-dense padded): h @ W2_pad + b2_pad.
    out = jnp.dot(h.astype(w2_ref.dtype), w2_ref[...],
                  preferred_element_type=jnp.float32)
    o_ref[...] = (out + b2_ref[...]).astype(o_ref.dtype)


def mlp_forward(x, w1_t, b1, gamma, beta, run_mean, run_var, w2_t, b2,
                *, block_b=None, compute_dtype=jnp.float32):
    """Fused MLP forward (eval semantics).

    x:      (B, D)
    w1_t:   (D, H)  -- Linear(dim, hidden) weight, pre-transposed
    b1, gamma, beta, run_mean, run_var: (1, H)
    w2_t:   (H, O)  -- Linear(hidden, 2) weight, pre-transposed
    b2:     (1, O)
    """
    B, D = x.shape
    H = w1_t.shape[1]
    O = w2_t.shape[1]

    # ---- Fold eval-mode BatchNorm + b1 into an effective W1/b1 (exact; ReLU follows affine).
    inv_std = jax.lax.rsqrt(run_var + BN_EPS)          # (1, H)
    scale = gamma * inv_std                            # (1, H)
    w1_eff = (w1_t * scale).astype(compute_dtype)      # (D, H)
    b1_eff = ((b1 - run_mean) * scale + beta).astype(jnp.float32)

    # ---- Lane-dense output: zero-pad W2^T / b2 to a multiple of 128 lanes.
    o_pad = max(128, ((O + 127) // 128) * 128)
    w2_pad = jnp.zeros((H, o_pad), compute_dtype).at[:, :O].set(w2_t.astype(compute_dtype))
    b2_pad = jnp.zeros((1, o_pad), jnp.float32).at[:, :O].set(b2.astype(jnp.float32))

    x_in = x.astype(compute_dtype)

    # ---- Batch grid: weights stay VMEM-resident, x/out tiles stream & pipeline.
    if block_b is None:
        block_b = B if B <= 128 else 128
    assert B % block_b == 0, "batch must be divisible by block_b"
    grid = (B // block_b,)

    out_padded = pl.pallas_call(
        _mlp_kernel,
        out_shape=jax.ShapeDtypeStruct((B, o_pad), jnp.float32),
        grid_spec=pltpu.PrefetchScalarGridSpec(
            num_scalar_prefetch=0,
            grid=grid,
            in_specs=[
                pl.BlockSpec((block_b, D), lambda i: (i, 0)),   # x tile (streamed)
                pl.BlockSpec((D, H),       lambda i: (0, 0)),   # W1_eff (resident)
                pl.BlockSpec((1, H),       lambda i: (0, 0)),   # b1_eff (resident)
                pl.BlockSpec((H, o_pad),   lambda i: (0, 0)),   # W2 padded (resident)
                pl.BlockSpec((1, o_pad),   lambda i: (0, 0)),   # b2 padded (resident)
            ],
            out_specs=pl.BlockSpec((block_b, o_pad), lambda i: (i, 0)),
        ),
        compiler_params=pltpu.CompilerParams(
            dimension_semantics=("parallel",),
        ),
    )(x_in, w1_eff, b1_eff, w2_pad, b2_pad)

    # Strip the lane padding outside the kernel.
    return out_padded[:, :O]


def _xavier_uniform(key, fan_in, fan_out):
    # matches torch.nn.init.xavier_uniform_ for a (fan_out, fan_in) weight
    bound = (6.0 / (fan_in + fan_out)) ** 0.5
    return jax.random.uniform(key, (fan_out, fan_in), jnp.float32, -bound, bound)


def _linear_bias(key, fan_in, fan_out):
    # matches torch default Linear bias init: U(-1/sqrt(fan_in), 1/sqrt(fan_in))
    bound = 1.0 / (fan_in ** 0.5)
    return jax.random.uniform(key, (1, fan_out), jnp.float32, -bound, bound)


if __name__ == "__main__":
    dim, hidden, batch = 32, 32, 64   # small; batch grid of 4 tiles of 16

    key = jax.random.PRNGKey(0)
    kx, kw1, kb1, kw2, kb2 = jax.random.split(key, 5)

    x = jax.random.normal(kx, (batch, dim), jnp.float32)

    # Layer 0: Linear(dim, hidden), xavier_uniform weight, default bias init.
    w1 = _xavier_uniform(kw1, dim, hidden)          # torch shape (hidden, dim)
    b1 = _linear_bias(kb1, dim, hidden)             # (1, hidden)
    w1_t = w1.T                                     # (dim, hidden) for x @ W

    # BatchNorm1d(hidden) defaults (running stats, eval mode).
    gamma = jnp.ones((1, hidden), jnp.float32)
    beta = jnp.zeros((1, hidden), jnp.float32)
    run_mean = jnp.zeros((1, hidden), jnp.float32)
    run_var = jnp.ones((1, hidden), jnp.float32)

    # Layer 4: Linear(hidden, 2), xavier_uniform weight, default bias init.
    w2 = _xavier_uniform(kw2, hidden, 2)            # torch shape (2, hidden)
    b2 = _linear_bias(kb2, hidden, 2)               # (1, 2)
    w2_t = w2.T                                     # (hidden, 2)

    out = mlp_forward(x, w1_t, b1, gamma, beta, run_mean, run_var, w2_t, b2,
                      block_b=16)
    out = jax.block_until_ready(out)

    # Pure-JAX reference check (unfolded eval semantics).
    h_ref = x @ w1_t + b1
    h_ref = (h_ref - run_mean) * jax.lax.rsqrt(run_var + BN_EPS) * gamma + beta
    h_ref = jnp.maximum(h_ref, 0.0)
    ref = h_ref @ w2_t + b2
    assert out.shape == (batch, 2)
    assert jnp.allclose(out, ref, atol=1e-5, rtol=1e-5)

    print("KERNEL_OK")
</pallas_src>

<mosaic_0001>
module attributes {stable_mosaic.version = 11 : i64} {
  func.func @_mlp_kernel(%arg0: i32, %arg1: memref<16x32xf32, #tpu.memory_space<vmem>>, %arg2: memref<32x32xf32, #tpu.memory_space<vmem>>, %arg3: memref<1x32xf32, #tpu.memory_space<vmem>>, %arg4: memref<32x128xf32, #tpu.memory_space<vmem>>, %arg5: memref<1x128xf32, #tpu.memory_space<vmem>>, %arg6: memref<16x128xf32, #tpu.memory_space<vmem>>) attributes {dimension_semantics = [#tpu.dimension_semantics<parallel>], iteration_bounds = array<i64: 4>, scalar_prefetch = 0 : i64, scratch_operands = 0 : i64, tpu.core_type = #tpu.core_type<tc>, window_params = [{transform_indices = @transform_0, window_bounds = array<i64: 16, 32>}, {pipeline_mode = #tpu.pipeline_mode<synchronous>, transform_indices = @transform_1, window_bounds = array<i64: 32, 32>}, {pipeline_mode = #tpu.pipeline_mode<synchronous>, transform_indices = @transform_2, window_bounds = array<i64: 1, 32>}, {pipeline_mode = #tpu.pipeline_mode<synchronous>, transform_indices = @transform_3, window_bounds = array<i64: 32, 128>}, {pipeline_mode = #tpu.pipeline_mode<synchronous>, transform_indices = @transform_4, window_bounds = array<i64: 1, 128>}, {transform_indices = @transform_5, window_bounds = array<i64: 16, 128>}]} {
    %c0 = arith.constant 0 : index
    %c0_0 = arith.constant 0 : index
    %0 = vector.load %arg1[%c0, %c0_0] : memref<16x32xf32, #tpu.memory_space<vmem>>, vector<16x32xf32>
    %c0_1 = arith.constant 0 : index
    %c0_2 = arith.constant 0 : index
    %1 = vector.load %arg2[%c0_1, %c0_2] : memref<32x32xf32, #tpu.memory_space<vmem>>, vector<32x32xf32>
    %cst = arith.constant dense<0.000000e+00> : vector<16x32xf32>
    %2 = tpu.matmul %0, %1, %cst {dimension_numbers = #tpu.dot_dimension_numbers<[1], [0], [0], [1], [0, 0, 1, 1], [], []>} : vector<16x32xf32>, vector<32x32xf32>, vector<16x32xf32> -> vector<16x32xf32>
    %c0_3 = arith.constant 0 : index
    %c0_4 = arith.constant 0 : index
    %3 = vector.load %arg3[%c0_3, %c0_4] : memref<1x32xf32, #tpu.memory_space<vmem>>, vector<1x32xf32>
    %4 = vector.broadcast %3 : vector<1x32xf32> to vector<16x32xf32>
    %5 = arith.addf %2, %4 : vector<16x32xf32>
    %cst_5 = arith.constant 0.000000e+00 : f32
    %6 = vector.broadcast %cst_5 : f32 to vector<16x32xf32>
    %7 = arith.maximumf %5, %6 : vector<16x32xf32>
    %c0_6 = arith.constant 0 : index
    %c0_7 = arith.constant 0 : index
    %8 = vector.load %arg4[%c0_6, %c0_7] : memref<32x128xf32, #tpu.memory_space<vmem>>, vector<32x128xf32>
    %cst_8 = arith.constant dense<0.000000e+00> : vector<16x128xf32>
    %9 = tpu.matmul %7, %8, %cst_8 {dimension_numbers = #tpu.dot_dimension_numbers<[1], [0], [0], [1], [0, 0, 1, 1], [], []>} : vector<16x32xf32>, vector<32x128xf32>, vector<16x128xf32> -> vector<16x128xf32>
    %c0_9 = arith.constant 0 : index
    %c0_10 = arith.constant 0 : index
    %10 = vector.load %arg5[%c0_9, %c0_10] : memref<1x128xf32, #tpu.memory_space<vmem>>, vector<1x128xf32>
    %11 = vector.broadcast %10 : vector<1x128xf32> to vector<16x128xf32>
    %12 = arith.addf %9, %11 : vector<16x128xf32>
    %c0_11 = arith.constant 0 : index
    %c0_12 = arith.constant 0 : index
    %13 = vector.load %arg6[%c0_11, %c0_12] : memref<16x128xf32, #tpu.memory_space<vmem>>, vector<16x128xf32>
    tpu.vector_store %arg6[%c0_11, %c0_12], %12 {strides = array<i32>} : memref<16x128xf32, #tpu.memory_space<vmem>>, vector<16x128xf32>,
    return
  }
  func.func @transform_0(%arg0: i32) -> (i32, i32) {
    %c0_i32 = arith.constant 0 : i32
    %c0_i32_0 = arith.constant 0 : i32
    return %arg0, %c0_i32 : i32, i32
  }
  func.func @transform_1(%arg0: i32) -> (i32, i32) {
    %c0_i32 = arith.constant 0 : i32
    %c0_i32_0 = arith.constant 0 : i32
    %c0_i32_1 = arith.constant 0 : i32
    return %c0_i32, %c0_i32_0 : i32, i32
  }
  func.func @transform_2(%arg0: i32) -> (i32, i32) {
    %c0_i32 = arith.constant 0 : i32
    %c0_i32_0 = arith.constant 0 : i32
    %c0_i32_1 = arith.constant 0 : i32
    return %c0_i32, %c0_i32_0 : i32, i32
  }
  func.func @transform_3(%arg0: i32) -> (i32, i32) {
    %c0_i32 = arith.constant 0 : i32
    %c0_i32_0 = arith.constant 0 : i32
    %c0_i32_1 = arith.constant 0 : i32
    return %c0_i32, %c0_i32_0 : i32, i32
  }
  func.func @transform_4(%arg0: i32) -> (i32, i32) {
    %c0_i32 = arith.constant 0 : i32
    %c0_i32_0 = arith.constant 0 : i32
    %c0_i32_1 = arith.constant 0 : i32
    return %c0_i32, %c0_i32_0 : i32, i32
  }
  func.func @transform_5(%arg0: i32) -> (i32, i32) {
    %c0_i32 = arith.constant 0 : i32
    %c0_i32_0 = arith.constant 0 : i32
    return %arg0, %c0_i32 : i32, i32
  }
}

</mosaic_0001>

<bundles_post_ra>
// kernel: tpu_custom_call.1
= control target key start
LH: loop header
LB: loop body
LE: loop exit
PB: predicated region body
PF: predicated region fallthrough
CT: control target
= control target key end

     0   :  { %10 = vsyncpa [#allocation3], 0  ;;  %s667_s0 = inlined_call_operand.vmem [shape: f32[64,32], index: 0, kind: input, shape index: {}]   ;;  %s668_s1 = inlined_call_operand.vmem [shape: f32[32,32], index: 1, kind: input, shape index: {}]   ;;  %s669_s2 = inlined_call_operand.vmem [shape: f32[1,32], index: 2, kind: input, shape index: {}]   ;;  %s670_s3 = inlined_call_operand.vmem [shape: f32[32,128], index: 3, kind: input, shape index: {}]   ;;  %s671_s4 = inlined_call_operand.vmem [shape: f32[1,128], index: 4, kind: input, shape index: {}]   ;;  %s672_s5 = inlined_call_operand.hbm [shape: f32[64,128], index: 5, kind: output, shape index: {}]  }
   0x1   :  { %12 = vsyncpa [#allocation3 + $0x1], 0  ;;  %s549_s18 = smov 0   ;;  %s551_s19 = smov 0  }
   0x2   :  { %s553_s20 = smov 0   ;;  %s555_s21 = smov 0  }
   0x3 LB: > { %s570_s22 = sadd.s32 4294967295, %s515_s21   ;;  %s385_s23 = sadd.s32 4294967294, %s515_s21   ;;  %s515_s21 = sphi %s555_s21, %s678_s21   ;;  %s511_s20 = sphi %s553_s20, %s677_s20   ;;  %s507_s19 = sphi %s551_s19, %s676_s19   ;;  %s503_s18 = sphi %s549_s18, %s675_s18  }
   0x4   : > { %s574_s24 = sadd.s32 1, %s515_s21   ;;  %s135_s25 = sadd.s32 1, %s511_s20 }
   0x5   : > { %s132_s26 = ssub.s32 %s515_s21, %s574_s24  ;;  %p145_p0 = scmp.ne.s32.totalorder %s511_s20, %s507_s19 }
   0x6   : > { %p133_p1 = scmp.eq.s32.totalorder %s132_s26, 0  ;;  %p146_p2 = scmp.eq.s32.totalorder %s570_s22, 3 }
   0x7   : > { %p151_p3 = scmp.ne.s32.totalorder %s507_s19, %s503_s18  ;;  %p152_p4 = scmp.eq.s32.totalorder %s385_s23, 3 }
   0x8   : > { %s585_s27 = scalar_select %p133_p1, %s511_s20, %s135_s25  }
   0x9   : > { %p587_p5 = por %p146_p2, %p145_p0  ;;  %p591_p6 = por %p152_p4, %p151_p3 }
   0xa   : > { %p388_p7 = scmp.ge.s32.totalorder %s515_s21, 1  ;;  %p191_p8 = scmp.lt.s32.totalorder %s515_s21, 5 }
   0xc   : > { %p192_p9 = pnand %p388_p7, %p191_p8 }
   0xd   : > { %s390_s9 = sshll.u32 (!%p192_p9), %s570_s22, 1  ;;  %s216_s12 = sand.u32 (!%p192_p9), 1, %s507_s19  }
   0xe   : > { %195 = sbr.rel (%p192_p9) target bundleno = 301 (0x12d), region = 40  ;;  %p220_p10 = scmp.lt.s32.totalorder (!%p192_p9), %s390_s9, 7 }
   0xf   : > { %s389_s13 = sshll.u32 (!%p192_p9), %s216_s12, 4  ;;  %s401_s17 = sshll.u32 (!%p192_p9), %s570_s22, 4 }
  0x10   : > { %s319_s26 = scalar_lea.hbm (!%p192_p9), %s672_s5, %s401_s17  ;;  %s308_s7 = scalar_lea.sflag (!%p192_p9), [#allocation3], %s216_s12 }
  0x11   : > { %s322_s6 = sshll.u32 (!%p192_p9), %s319_s26, 4  ;;  %s473_s11 = scalar_lea.hbm (!%p192_p9), %s672_s5, 64  ;;  %s323_s6 = int_to_ptr.hbm [resolvable:$true] %s322_s6 }
  0x12   : > { %s467_s8 = sshra.s32 (!%p192_p9), %s323_s6, 4  ;;  %s468_s8 = int_to_ptr.hbm [resolvable:$true] %s467_s8 }
  0x13   : > { %v231_v0 = vld [vmem:[%s668_s1 + $0x18] sm:$0xff]  ;;  %v230_v1 = vld [vmem:[%s668_s1 + $0x10] sm:$0xff]  ;;  %v229_v3 = vld [vmem:[%s668_s1 + $0x8] sm:$0xff]  ;;  %s680_s9 = smov (!%p220_p10, %s390_s9), 7  ;;  %vm236_vm0 = vcmask 261120   ;;  %p474_p0 = scmp.lt.s32.totalorder %s468_s8, %s672_s5 }
  0x14   : > { %402 = vmatpush.msra.mxu2 %v231_v0  ;;  %255 = vmatpush.msra.mxu0 %v231_v0  ;;  %v271_v2 = vld [vmem:[%s670_s3 + $0x18] sm:$0xff]  ;;  %v228_v4 = vld [vmem:[%s668_s1] sm:$0xff]  ;;  %s391_s16 = sshll.u32 %s680_s9, 3  ;;  %v270_v7 = vld [vmem:[%s670_s3 + $0x10] sm:$0xff]  ;;  %s469_s9 = scalar_lea.hbm %s468_s8, 16 }
  0x15   : > { %406 = vmatpush.msra.mxu3 %v271_v2  ;;  %294 = vmatpush.msra.mxu1 %v271_v2  ;;  %s223_s25 = scalar_lea.vmem %s667_s0, %s391_s16  ;;  %v269_v8 = vld [vmem:[%s670_s3 + $0x8] sm:$0xff]  ;;  %v268_v9 = vld [vmem:[%s670_s3] sm:$0xff]  ;;  %s218_s16 = scalar_lea.vmem [#allocation2], %s389_s13 }
  0x16   : > { %403 = vmatpush.msra.mxu2 %v230_v1  ;;  %256 = vmatpush.msra.mxu0 %v230_v1  ;;  %v227_v5 = vld [vmem:[%s223_s25 + $0x8] sm:$0xff]  ;;  %v226_v6 = vld [vmem:[%s223_s25] sm:$0xff]  ;;  %s320_s30 = sshll.u32 %s218_s16, 4  ;;  %p470_p11 = scmp.ne.s32.totalorder %s468_s8, %s469_s9  ;;  %s321_s30 = int_to_ptr.vmem [resolvable:$true] %s320_s30 }
  0x17   : > { %407 = vmatpush.msra.mxu3 %v270_v7  ;;  %295 = vmatpush.msra.mxu1 %v270_v7  ;;  %v451_v10 = vld [vmem:[%s669_s2] ss:$0 sm:$0xff]  ;;  %p475_p1 = scmp.lt.s32.totalorder %s473_s11, %s469_s9 }
  0x18   : > { %404 = vmatpush.msra.mxu2 %v229_v3  ;;  %257 = vmatpush.msra.mxu0 %v229_v3  ;;  %v452_v17 = vld [vmem:[%s671_s4] ss:$0 sm:$0xff]  ;;  %p471_p12 = pnand %p470_p11, %p587_p5 }
  0x19   : > { %408 = vmatpush.msra.mxu3 %v269_v8  ;;  %296 = vmatpush.msra.mxu1 %v269_v8  ;;  %p476_p2 = por %p475_p1, %p474_p0 }
  0x1a   : > { %405 = vmatpush.msra.mxu2 %v228_v4  ;;  %258 = vmatpush.msra.mxu0 %v228_v4  ;;  %p472_p13 = pneg %p471_p12 }
  0x1b   : > { %393 = vmatmul.msk.f32.vlgmr.msra.gmra.mxu2 %vm236_vm0, %v227_v5  ;;  %392 = vmatmul.msk.f32.vlgmr.msra.gmra.mxu0 %vm236_vm0, %v226_v6 }
  0x1c   : > { %409 = vmatpush.msra.mxu3 %v268_v9  ;;  %297 = vmatpush.msra.mxu1 %v268_v9  ;;  %p477_p3 = pnand %p476_p2, %p472_p13 }
  0x98   : > { %v260_v11 = vpop.f32.mrf.mxu0 }
  0x99   : > { %v261_v12 = vadd.f32 %v451_v10, %v260_v11 }
  0x9b   : > { %v266_v13 = vmax.f32 %v261_v12, 0.0 }
  0x9d   : > { %394 = vmatmul.msk.f32.vlgmr.msra.gmra.mxu1 %vm236_vm0, %v266_v13 }
  0x9e   : > { %v263_v14 = vpop.f32.mrf.mxu2 }
  0x9f   : > { %v264_v15 = vadd.f32 %v451_v10, %v263_v14 }
  0xa1   : > { %v267_v16 = vmax.f32 %v264_v15, 0.0 }
  0xa3   : > { %395 = vmatmul.msk.f32.vlgmr.msra.gmra.mxu3 %vm236_vm0, %v267_v16 }
 0x11a   : > { %v299_v18 = vpop.f32.mrf.mxu1 }
 0x11b   : > { %v300_v19 = vadd.f32 %v452_v17, %v299_v18 }
 0x11d   : > { %305 = vst [vmem:[%s218_s16] sm:$0xff] %v300_v19 }
 0x126   : > { %v302_v20 = vpop.f32.mrf.mxu3 }
 0x127   : > { %v303_v21 = vadd.f32 %v452_v17, %v302_v20 }
 0x129   : > { %306 = vst [vmem:[%s218_s16 + $0x8] sm:$0xff] %v303_v21 }
 0x12a   : > { %480 = shalt.err (!%p477_p3)
}
 0x12b   : > { %s517_s12 = smov 128   ;;  %s518_s15 = smov 8  }
 0x12c   : > { %410 = dma.vmem_to_hbm [thread:$0]  (%p587_p5), %s321_s30, 256, %s323_s6, %s308_s7, %s517_s12, %s517_s12, %s518_s15  }
 0x12d PF: > { %p416_p4 = scmp.ge.s32.totalorder %s515_s21, 2  ;;  %s337_s16 = sand.u32 1, %s503_s18  }
 0x12e   : > { %s338_s17 = scalar_lea.sflag [#allocation3], %s337_s16 }
 0x12f   : > { %p413_p7 = pnand %p416_p4, %p591_p6 }
 0x131   : > { %p414_p8 = pneg %p413_p7 }
 0x133   : > { %498 = dma.done.wait (%p414_p8), %s338_s17, 256  }
 0x134   : > { %500 = vsyncadd (%p414_p8), %s338_s17, 4294967040  ;;  %p15_p9 = scmp.ge.s32.totalorder %s574_s24, 6   ;;  %s675_s18 = smov %s507_s19 }
 0x135   : > { %s676_s19 = smov %s511_s20  ;;  %s677_s20 = smov %s585_s27 }
 0x136   : > { %s678_s21 = smov %s574_s24  ;;  %17 = sbr.rel (!%p15_p9) target bundleno = 3 (0x3), region = 75 }
 0x13b   :  { %344 = vsyncpa [#allocation3], 1 }
 0x13c   :  { %346 = vsyncpa [#allocation3 + $0x1], 1 }

</bundles_post_ra>
